<compile_context>
chip_gen: v5e
topology: v5e:2x2
jax: 0.10.0
libtpu: 0.0.40
codegen_flags: <defaults>
</compile_context>

<pallas_src>
import math

import jax
import jax.numpy as jnp
from jax.experimental import pallas as pl
from jax.experimental.pallas import tpu as pltpu

_LANE = 128
_SUBLANE = 8


def _masking_kernel(img_ref, keep_ref, out_ref):
    # img_ref / out_ref: (C, TR, LW) in the image dtype.
    # keep_ref: (1, TR, LW) in the image dtype, values in {0, 1} (1 == keep).
    # Single full-tile multiply; the (1, ...) -> (C, ...) broadcast is along the
    # major dim only (no lane/sublane movement) and happens once per grid step.
    out_ref[...] = img_ref[...] * keep_ref[...]


def _ceil_div(a, b):
    return -(-a // b)


def _vmem_capacity_bytes():
    """Physical per-core VMEM queried from the device; conservative fallback."""
    try:
        info = pltpu.get_tpu_info()
        cap = getattr(info, "vmem_capacity_bytes", None)
        if cap:
            return int(cap)
    except Exception:
        pass
    return 64 * 1024 * 1024  # v7x per-TensorCore VMEM (smallest of v5e/v6e/v7x)


def _choose_lane_width(H, W):
    """Largest lane-dense (multiple-of-128) row width that divides H*W.

    Prefers a width that also leaves >= 8 rows (full sublane tiles).  Falls
    back to W itself (a full-extent last dim is always a legal BlockSpec)."""
    n = H * W
    best = None
    for lw in (2048, 1024, 512, 256, 128):
        if n % lw == 0:
            if n // lw >= _SUBLANE:
                return lw
            if best is None:
                best = lw
    return best if best is not None else W


def _pipelined_bytes(tr, C, lw, itemsize):
    # Double-buffered pipeline footprint: image-in + image-out + keep tiles.
    return 2 * (2 * C + 1) * tr * lw * itemsize


def _choose_tile_rows(R, C, lw, itemsize, budget):
    """Row-tile height: a multiple of 8 sublanes that fits the VMEM budget and,
    when possible, yields >= 2 roughly balanced grid steps (megacore sharding)."""
    if R <= _SUBLANE:
        return R  # full-extent block (legal even when R < 8)
    per_row = _pipelined_bytes(1, C, lw, itemsize)
    fit = max(int(budget // per_row), _SUBLANE)
    fit = (fit // _SUBLANE) * _SUBLANE
    # >= 2 balanced steps so the "parallel" axis can shard across v7x's 2 TCs.
    half = _ceil_div(_ceil_div(R, 2), _SUBLANE) * _SUBLANE
    return max(min(fit, half), _SUBLANE)


def image_masking_transform(image, key, patch_size=32, mask_ratio=0.6):
    """JAX/Pallas equivalent of ImageMaskingTransform.forward.

    Returns:
      masked_image: (C, H, W), image dtype.
      mask_full:    (1, H, W), bool, True == masked patch.
    """
    C, H, W = image.shape
    P = patch_size
    assert H % P == 0 and W % P == 0, (
        "Image dimensions must be divisible by patch_size"
    )
    ph, pw = H // P, W // P
    num_patches = ph * pw
    num_masked = math.ceil(mask_ratio * num_patches)  # matches the module's math.ceil

    # Glue: torch.randperm(num_patches)[:num_masked] equivalent.
    perm = jax.random.permutation(key, num_patches)
    pmask = (jnp.zeros((num_patches,), jnp.bool_)
             .at[perm[:num_masked]].set(True)
             .reshape(ph, pw))                                   # True == masked

    # Module output: full-resolution bool mask (cheap broadcast of the tiny
    # patch mask); it is also reused to build the kernel's keep stream.
    mask_full = jnp.repeat(jnp.repeat(pmask, P, axis=0), P, axis=1)[None, :, :]

    # Lane-dense re-layout of the spatial axes: (C, H, W) -> (C, R, LW), a free
    # row-major reshape with LW a multiple of 128 whenever H*W allows.
    LW = _choose_lane_width(H, W)
    R = (H * W) // LW
    img3 = image.reshape(C, R, LW)

    # Full-resolution keep mask in the image dtype (1 == keep), same layout.
    keep3 = jnp.logical_not(mask_full).astype(image.dtype).reshape(1, R, LW)

    itemsize = jnp.dtype(image.dtype).itemsize
    vmem_cap = _vmem_capacity_bytes()
    budget = min((2 * vmem_cap) // 5, 48 * 1024 * 1024)  # pipelined footprint target
    TR = _choose_tile_rows(R, C, LW, itemsize, budget)
    footprint = _pipelined_bytes(TR, C, LW, itemsize)
    vmem_limit = footprint + footprint // 4 + (1 << 20)           # +25% + slack
    vmem_limit = min(vmem_limit, (3 * vmem_cap) // 4, 96 * 1024 * 1024)
    vmem_limit = int(max(vmem_limit, 16 * 1024 * 1024))

    grid = (pl.cdiv(R, TR),)

    masked3 = pl.pallas_call(
        _masking_kernel,
        grid=grid,
        in_specs=[
            pl.BlockSpec((C, TR, LW), lambda i: (0, i, 0)),
            pl.BlockSpec((1, TR, LW), lambda i: (0, i, 0)),
        ],
        out_specs=pl.BlockSpec((C, TR, LW), lambda i: (0, i, 0)),
        out_shape=jax.ShapeDtypeStruct((C, R, LW), image.dtype),
        compiler_params=pltpu.CompilerParams(
            dimension_semantics=("parallel",),   # shard row-tiles across TCs (v7x)
            vmem_limit_bytes=vmem_limit,
        ),
    )(img3, keep3)

    return masked3.reshape(C, H, W), mask_full


def _reference(image, key, patch_size, mask_ratio):
    """Pure-JAX reference of the module semantics (same RNG usage)."""
    C, H, W = image.shape
    ph, pw = H // patch_size, W // patch_size
    num_patches = ph * pw
    num_masked = math.ceil(mask_ratio * num_patches)
    perm = jax.random.permutation(key, num_patches)
    pmask = (jnp.zeros((num_patches,), jnp.bool_)
             .at[perm[:num_masked]].set(True)
             .reshape(ph, pw))
    mask_full = jnp.repeat(jnp.repeat(pmask, patch_size, 0), patch_size, 1)[None]
    masked = image * (1.0 - mask_full.astype(image.dtype))
    return masked, mask_full


if __name__ == "__main__":
    root = jax.random.PRNGKey(0)

    cases = [
        # (C, H, W, patch_size, mask_ratio)
        (4, 16, 16, 4, 0.6),      # tiny smoke test (single grid step)
        (3, 128, 256, 32, 0.6),   # module default patch size, 2-step grid
    ]

    for idx, (C, H, W, P, ratio) in enumerate(cases):
        k_img, k_mask = jax.random.split(jax.random.fold_in(root, idx))
        image = jax.random.uniform(k_img, (C, H, W), dtype=jnp.float32)

        masked_image, mask_full = image_masking_transform(
            image, k_mask, patch_size=P, mask_ratio=ratio
        )
        masked_image = jax.block_until_ready(masked_image)
        mask_full = jax.block_until_ready(mask_full)

        ref_img, ref_mask = _reference(image, k_mask, P, ratio)

        assert masked_image.shape == (C, H, W) and masked_image.dtype == image.dtype
        assert mask_full.shape == (1, H, W) and mask_full.dtype == jnp.bool_
        assert jnp.allclose(masked_image, ref_img)
        assert jnp.array_equal(mask_full, ref_mask)
        assert int(mask_full[0, ::P, ::P].sum()) == math.ceil(
            ratio * (H // P) * (W // P)
        )

    print("KERNEL_OK")
</pallas_src>

<mosaic_0001>
module attributes {stable_mosaic.version = 11 : i64} {
  func.func @_masking_kernel(%arg0: i32, %arg1: memref<4x1x256xf32, #tpu.memory_space<vmem>>, %arg2: memref<1x1x256xf32, #tpu.memory_space<vmem>>, %arg3: memref<4x1x256xf32, #tpu.memory_space<vmem>>) attributes {dimension_semantics = [#tpu.dimension_semantics<parallel>], iteration_bounds = array<i64: 1>, scalar_prefetch = 0 : i64, scratch_operands = 0 : i64, tpu.core_type = #tpu.core_type<tc>, window_params = [{transform_indices = @transform_0, window_bounds = array<i64: 4, 1, 256>}, {transform_indices = @transform_1, window_bounds = array<i64: 1, 1, 256>}, {transform_indices = @transform_2, window_bounds = array<i64: 4, 1, 256>}]} {
    %c0 = arith.constant 0 : index
    %c0_0 = arith.constant 0 : index
    %c0_1 = arith.constant 0 : index
    %0 = vector.load %arg1[%c0, %c0_0, %c0_1] : memref<4x1x256xf32, #tpu.memory_space<vmem>>, vector<4x1x256xf32>
    %c0_2 = arith.constant 0 : index
    %c0_3 = arith.constant 0 : index
    %c0_4 = arith.constant 0 : index
    %1 = vector.load %arg2[%c0_2, %c0_3, %c0_4] : memref<1x1x256xf32, #tpu.memory_space<vmem>>, vector<1x1x256xf32>
    %2 = vector.broadcast %1 : vector<1x1x256xf32> to vector<4x1x256xf32>
    %3 = arith.mulf %0, %2 : vector<4x1x256xf32>
    %c0_5 = arith.constant 0 : index
    %c0_6 = arith.constant 0 : index
    %c0_7 = arith.constant 0 : index
    %4 = vector.load %arg3[%c0_5, %c0_6, %c0_7] : memref<4x1x256xf32, #tpu.memory_space<vmem>>, vector<4x1x256xf32>
    tpu.vector_store %arg3[%c0_5, %c0_6, %c0_7], %3 {strides = array<i32>} : memref<4x1x256xf32, #tpu.memory_space<vmem>>, vector<4x1x256xf32>,
    return
  }
  func.func @transform_0(%arg0: i32) -> (i32, i32, i32) {
    %c0_i32 = arith.constant 0 : i32
    %c0_i32_0 = arith.constant 0 : i32
    %c0_i32_1 = arith.constant 0 : i32
    return %c0_i32, %arg0, %c0_i32_0 : i32, i32, i32
  }
  func.func @transform_1(%arg0: i32) -> (i32, i32, i32) {
    %c0_i32 = arith.constant 0 : i32
    %c0_i32_0 = arith.constant 0 : i32
    %c0_i32_1 = arith.constant 0 : i32
    return %c0_i32, %arg0, %c0_i32_0 : i32, i32, i32
  }
  func.func @transform_2(%arg0: i32) -> (i32, i32, i32) {
    %c0_i32 = arith.constant 0 : i32
    %c0_i32_0 = arith.constant 0 : i32
    %c0_i32_1 = arith.constant 0 : i32
    return %c0_i32, %arg0, %c0_i32_0 : i32, i32, i32
  }
}

</mosaic_0001>

<bundles_post_ra>
// kernel: tpu_custom_call.1
= control target key start
LH: loop header
LB: loop body
LE: loop exit
PB: predicated region body
PF: predicated region fallthrough
CT: control target
= control target key end

     0   :  { %7 = vsyncpa [#allocation3], 0  ;;  %s209_s0 = inlined_call_operand.hbm [shape: f32[4,1,256], index: 0, kind: input, shape index: {}]   ;;  %s210_s1 = inlined_call_operand.hbm [shape: f32[1,1,256], index: 1, kind: input, shape index: {}]   ;;  %s211_s2 = inlined_call_operand.hbm [shape: f32[4,1,256], index: 2, kind: output, shape index: {}]  }
   0x1   :  { %8 = vsyncpa [#allocation6], 0 }
   0x2   :  { %9 = vsyncpa [#allocation4], 0  ;;  %s14_s11 = sshll.u32 %s209_s0, 4  ;;  %s162_s12 = smov [#allocation2]   ;;  %s15_s11 = int_to_ptr.hbm [resolvable:$true] %s14_s11 }
   0x3   :  { %s16_s13 = sshll.u32 %s162_s12, 4  ;;  %s28_s16 = sshll.u32 %s210_s1, 4  ;;  %s17_s13 = int_to_ptr.vmem [resolvable:$true] %s16_s13  ;;  %s29_s16 = int_to_ptr.hbm [resolvable:$true] %s28_s16 }
   0x4   :  { %s163_s17 = smov 32   ;;  %s164_s18 = smov 2  }
   0x5   :  { %22 = dma.hbm_to_vmem [thread:$0]  %s15_s11, 128, %s17_s13, [#allocation3], %s163_s17, %s163_s17, %s164_s18  }
   0x6   :  { %s165_s19 = smov [#allocation5]  }
   0x7   :  { %s30_s20 = sshll.u32 %s165_s19, 4  ;;  %s31_s20 = int_to_ptr.vmem [resolvable:$true] %s30_s20 }
   0x8   :  { %33 = dma.hbm_to_vmem [thread:$0]  %s29_s16, 32, %s31_s20, [#allocation6]  }
   0x9   :  { %156 = dma.done.wait [#allocation3], 128  }
   0xa   :  { %157 = vsyncadd [#allocation3], 4294967168 }
   0xb   :  { %158 = dma.done.wait [#allocation6], 32  }
   0xc   :  { %159 = vsyncadd [#allocation6], 4294967264  ;;  %v51_v0 = vlaneseq  ;;  %v42_v2 = vld [vmem:[#allocation2] sm:$0x3]  ;;  %v46_v3 = vld [vmem:[#allocation5] sm:$0x3] }
   0xd   :  { %v43_v4 = vld [vmem:[#allocation2 + $0x2] sm:$0x3]  ;;  %v47_v5 = vmul.f32 %v46_v3, %v42_v2  ;;  %v44_v7 = vld [vmem:[#allocation2 + $0x4] sm:$0x3]  ;;  %v45_v8 = vld [vmem:[#allocation2 + $0x6] sm:$0x3] }
   0xe   :  { %vm191_vm0 = vcmp.lt.s32.totalorder %v51_v0, 256  ;;  %v48_v6 = vmul.f32 %v46_v3, %v43_v4  ;;  %s166_s0 = smov [#allocation7]   ;;  %s65_s23 = sshll.u32 %s211_s2, 4  ;;  %v49_v9 = vmul.f32 %v46_v3, %v44_v7  ;;  %v50_v10 = vmul.f32 %v46_v3, %v45_v8  ;;  %s66_s23 = int_to_ptr.hbm [resolvable:$true] %s65_s23 }
   0xf   :  { %s63_s1 = sshll.u32 %s166_s0, 4  ;;  %55 = vst.msk [vmem:[#allocation7] sm:$0x3] %vm191_vm0, %v47_v5  ;;  %s64_s1 = int_to_ptr.vmem [resolvable:$true] %s63_s1 }
  0x10   :  { %56 = vst.msk [vmem:[#allocation7 + $0x2] sm:$0x3] %vm191_vm0, %v48_v6 }
  0x11   :  { %57 = vst.msk [vmem:[#allocation7 + $0x4] sm:$0x3] %vm191_vm0, %v49_v9 }
  0x12   :  { %58 = vst.msk [vmem:[#allocation7 + $0x6] sm:$0x3] %vm191_vm0, %v50_v10 }
  0x13   :  { %71 = dma.vmem_to_hbm [thread:$0]  %s64_s1, 128, %s66_s23, [#allocation4], %s163_s17, %s163_s17, %s164_s18  }
  0x14   :  { %160 = dma.done.wait [#allocation4], 128  }
  0x15   :  { %161 = vsyncadd [#allocation4], 4294967168 }
  0x16   :  { %76 = vsyncpa [#allocation3], 1 }
  0x17   :  { %77 = vsyncpa [#allocation6], 1 }
  0x18   :  { %78 = vsyncpa [#allocation4], 1 }

</bundles_post_ra>
